<compile_context>
chip_gen: v6e
topology: v6e:2x2x1
jax: 0.10.0
libtpu: 0.0.40
codegen_flags: <defaults>
</compile_context>

<pallas_src>
import functools

import jax
import jax.numpy as jnp
from jax.experimental import pallas as pl
from jax.experimental.pallas import tpu as pltpu

_LANE = 128
_MASK_NEG = -1e30  # finite "minus infinity" — safe even if a row were fully masked


def _self_attention_kernel(xq_ref, xk_ref, xv_ref, w_ref, b_ref, o_ref, *,
                           bt, s, dp, causal, compute_dtype):
    """One grid step == one batch tile of `bt` sequences.

    xq/xk/xv_ref: (bt, s, D)   raw Q/K/V inputs (compute_dtype)
    w_ref       : (3, D, Dp)   stacked, transposed, lane-padded weights
                               (WQ already carries the 1/sqrt(D) scale)
    b_ref       : (3, 1, Dp)   stacked, lane-padded biases (f32, bQ scaled)
    o_ref       : (bt, s, Dp)  lane-dense output slab (compute_dtype)
    """
    rows = bt * s
    d = xq_ref.shape[-1]

    def project(x_ref, g):
        # reshape is a pure view when s % 8 == 0 (sublane-aligned); otherwise a
        # one-off VMEM relayout — perf trap only, never a correctness issue.
        x = x_ref[...].reshape(rows, d)
        p = jnp.dot(x, w_ref[g], preferred_element_type=jnp.float32) + b_ref[g]
        return p.reshape(bt, s, dp)

    q = project(xq_ref, 0)          # 1/sqrt(D) already folded into WQ / bQ
    k = project(xk_ref, 1)
    v = project(xv_ref, 2)

    # Scaled scores via transposed-contraction einsum (no explicit K.T / XLU).
    z = jnp.einsum("bqd,bkd->bqk",
                   q.astype(compute_dtype), k.astype(compute_dtype),
                   preferred_element_type=jnp.float32)        # (bt, s, s) f32

    if causal:
        # Single (S, S) iota pair, broadcast over the batch-tile dim.
        row = jax.lax.broadcasted_iota(jnp.int32, (s, s), 0)
        col = jax.lax.broadcasted_iota(jnp.int32, (s, s), 1)
        neg = jnp.where(col > row, jnp.float32(_MASK_NEG), jnp.float32(0.0))
        z = z + neg[None, :, :]
        # TODO(synk): the PyTorch reference also print()s the masked score
        # tensor; there is no in-kernel tensor-printing equivalent.

    # Numerically stable softmax, kept in f32 (v5e has no bf16 VPU/EUP).
    z = z - jnp.max(z, axis=-1, keepdims=True)
    e = jnp.exp(z)
    denom = jnp.sum(e, axis=-1, keepdims=True)
    r = pl.reciprocal(denom, approx=True)        # EUP vrcp (free slot)
    r = r * (2.0 - denom * r)                    # one Newton step -> ~f32 accuracy
    p = e * r

    out = jnp.einsum("bqk,bkd->bqd",
                     p.astype(compute_dtype), v.astype(compute_dtype),
                     preferred_element_type=jnp.float32)       # (bt, s, Dp)
    o_ref[...] = out.astype(o_ref.dtype)


def _ceil_to(x, m):
    return -(-x // m) * m


def _vmem_capacity_bytes():
    """Per-generation VMEM capacity; conservative 64 MiB (v7x) fallback."""
    try:
        return int(pltpu.get_tpu_info().vmem_capacity_bytes)
    except Exception:
        return 64 << 20


def _pick_batch_tile(B, S, D, Dp, in_itemsize, out_itemsize, vmem_budget):
    """Largest divisor-of-B batch tile that (a) targets ~1024 matmul rows per
    grid step, (b) fits the VMEM budget, and (c) leaves >= 2 grid steps when
    B >= 2 so v7x's 2 TensorCores both get work."""
    s8 = _ceil_to(S, 8)
    dl = _ceil_to(D, _LANE)            # VMEM lane padding of the input blocks
    sl = _ceil_to(S, _LANE)            # lane padding of the (s, s) score block

    def footprint(bt):
        inputs = 3 * 2 * bt * s8 * dl * in_itemsize          # Q/K/V, dbl-buffered
        weights = 2 * 3 * _ceil_to(D, 8) * Dp * in_itemsize + 2 * 3 * 8 * Dp * 4
        outputs = 2 * bt * s8 * Dp * out_itemsize
        interm = 4 * bt * s8 * Dp * 4 + 3 * bt * s8 * sl * 4  # q,k,v,out + z/e/p
        return inputs + weights + outputs + interm

    def divisor_at_most(n):
        n = max(1, min(n, B))
        while n > 1 and B % n != 0:
            n -= 1
        return n

    rows_target = 1024
    bt = divisor_at_most(max(1, rows_target // S))
    while bt > 1 and footprint(bt) > vmem_budget:
        bt = divisor_at_most(bt - 1)
    if B >= 2:                          # megacore: keep >= 2 grid steps (v7x)
        bt = min(bt, divisor_at_most(B // 2))
    return bt, footprint(bt)


def self_attention(Q, K, V, params, mask=False, compute_dtype=jnp.float32,
                   return_padded=False):
    """Pallas implementation of SelfAttention.forward.

    Q, K, V: (B, S, D) float32
    params : PyTorch-convention weights: WQ/WK/WV (D, D), bQ/bK/bV (D,)
    compute_dtype: jnp.float32 (exact) or jnp.bfloat16 (full-rate MXU path on
                   v5e/v6e/v7x; f32 accumulation, softmax stays f32; output is
                   stored in bf16, halving writeback bytes).
    return_padded: if True, return the lane-padded (B, S, Dp) slab and skip the
                   separate out[..., :D] slice pass (padded columns are zero).
    """
    B, S, D = Q.shape
    assert K.shape == (B, S, D) and V.shape == (B, S, D)
    compute_dtype = jnp.dtype(compute_dtype)
    out_dtype = compute_dtype

    # Lane-pad the projection output dim so every kernel tile is 128-lane dense.
    # (On v6e/v7x with large D, padding to a 256 multiple would fully fill the
    #  2x256 MXU; at D <= 128 the 128-lane pad is already optimal.)
    Dp = max(_LANE, _ceil_to(D, _LANE))
    pad = Dp - D
    scale = 1.0 / (float(D) ** 0.5)

    # Weight prep (cheap; hoist outside the hot loop if weights are static).
    def prep_w(w, s_=1.0):                 # (out, in) torch -> (in, out_padded)
        wt = (w * s_).T.astype(jnp.float32)
        return jnp.pad(wt, ((0, 0), (0, pad))) if pad else wt

    def prep_b(b, s_=1.0):
        b = (b * s_).astype(jnp.float32)
        return jnp.pad(b, (0, pad)) if pad else b

    w_all = jnp.stack([prep_w(params["WQ"], scale),      # scale folded into WQ
                       prep_w(params["WK"]),
                       prep_w(params["WV"])], axis=0)                 # (3, D, Dp)
    b_all = jnp.stack([prep_b(params["bQ"], scale),      # ... and into bQ
                       prep_b(params["bK"]),
                       prep_b(params["bV"])], axis=0).reshape(3, 1, Dp)

    if compute_dtype != jnp.dtype(jnp.float32):
        Q, K, V = (t.astype(compute_dtype) for t in (Q, K, V))
        w_all = w_all.astype(compute_dtype)   # f32 accumulation in-kernel

    in_itemsize = compute_dtype.itemsize
    out_itemsize = jnp.dtype(out_dtype).itemsize

    vmem_cap = _vmem_capacity_bytes()
    Bt, footprint = _pick_batch_tile(B, S, D, Dp, in_itemsize, out_itemsize,
                                     vmem_budget=vmem_cap // 2)
    n_steps = B // Bt
    vmem_limit = int(min(max(vmem_cap - (8 << 20), 16 << 20),
                         max(2 * footprint, 32 << 20)))

    kernel = functools.partial(_self_attention_kernel, bt=Bt, s=S, dp=Dp,
                               causal=mask, compute_dtype=compute_dtype)

    cost = pl.CostEstimate(
        flops=int(2 * 3 * B * S * D * Dp + 4 * B * S * S * Dp),
        transcendentals=int(B * S * S),
        bytes_accessed=int(3 * B * S * D * in_itemsize
                           + 3 * D * Dp * in_itemsize + 3 * Dp * 4
                           + B * S * Dp * out_itemsize),
    )

    out = pl.pallas_call(
        kernel,
        out_shape=jax.ShapeDtypeStruct((B, S, Dp), out_dtype),
        grid_spec=pltpu.PrefetchScalarGridSpec(
            num_scalar_prefetch=0,
            grid=(n_steps,),
            in_specs=[
                pl.BlockSpec((Bt, S, D), lambda i: (i, 0, 0)),   # Q
                pl.BlockSpec((Bt, S, D), lambda i: (i, 0, 0)),   # K
                pl.BlockSpec((Bt, S, D), lambda i: (i, 0, 0)),   # V
                pl.BlockSpec((3, D, Dp), lambda i: (0, 0, 0)),   # weights (resident)
                pl.BlockSpec((3, 1, Dp), lambda i: (0, 0, 0)),   # biases  (resident)
            ],
            out_specs=pl.BlockSpec((Bt, S, Dp), lambda i: (i, 0, 0)),
        ),
        compiler_params=pltpu.CompilerParams(
            dimension_semantics=("parallel",),
            vmem_limit_bytes=vmem_limit),
        cost_estimate=cost,
    )(Q, K, V, w_all, b_all)

    if return_padded or pad == 0:
        return out
    return out[..., :D]


def _reference(Q, K, V, params, mask=False):
    """Pure-JAX reference mirroring the PyTorch forward."""
    def linear(x, W, b):
        return x @ W.T + b
    q = linear(Q, params["WQ"], params["bQ"])
    k = linear(K, params["WK"], params["bK"])
    v = linear(V, params["WV"], params["bV"])
    z = jnp.matmul(q, jnp.swapaxes(k, -1, -2)) / jnp.sqrt(jnp.float32(q.shape[-1]))
    if mask:
        S = z.shape[-1]
        tri = jnp.triu(jnp.ones((S, S), jnp.bool_), k=1)
        z = jnp.where(tri, -jnp.inf, z)
    z = jax.nn.softmax(z, axis=-1)
    return jnp.matmul(z, v)


if __name__ == "__main__":
    B, S, D = 2, 8, 32
    key = jax.random.PRNGKey(0)
    kq, kk, kv, kwq, kwk, kwv, kbq, kbk, kbv = jax.random.split(key, 9)

    Q = jax.random.normal(kq, (B, S, D), dtype=jnp.float32)
    K = jax.random.normal(kk, (B, S, D), dtype=jnp.float32)
    V = jax.random.normal(kv, (B, S, D), dtype=jnp.float32)

    bound = 1.0 / jnp.sqrt(jnp.float32(D))
    params = {
        "WQ": jax.random.uniform(kwq, (D, D), jnp.float32, -bound, bound),
        "WK": jax.random.uniform(kwk, (D, D), jnp.float32, -bound, bound),
        "WV": jax.random.uniform(kwv, (D, D), jnp.float32, -bound, bound),
        "bQ": jax.random.uniform(kbq, (D,), jnp.float32, -bound, bound),
        "bK": jax.random.uniform(kbk, (D,), jnp.float32, -bound, bound),
        "bV": jax.random.uniform(kbv, (D,), jnp.float32, -bound, bound),
    }

    # f32 path (exact): unmasked + causal-masked.
    out = jax.block_until_ready(self_attention(Q, K, V, params, mask=False))
    ref = _reference(Q, K, V, params, mask=False)
    assert jnp.allclose(out, ref, atol=1e-5, rtol=1e-5), "mismatch vs reference"

    out_m = jax.block_until_ready(self_attention(Q, K, V, params, mask=True))
    ref_m = _reference(Q, K, V, params, mask=True)
    assert jnp.allclose(out_m, ref_m, atol=1e-5, rtol=1e-5), "masked mismatch"

    # bf16 MXU fast path (valid on all generations): f32 accumulation, f32
    # softmax, bf16 output; loose tolerance.
    out_bf16 = jax.block_until_ready(
        self_attention(Q, K, V, params, mask=False, compute_dtype=jnp.bfloat16))
    assert jnp.allclose(out_bf16, ref, atol=1e-1, rtol=1e-1), "bf16 path mismatch"

    print("KERNEL_OK")
</pallas_src>

<mosaic_0001>
module attributes {stable_mosaic.version = 11 : i64} {
  func.func @_self_attention_kernel(%arg0: i32, %arg1: memref<1x8x32xf32, #tpu.memory_space<vmem>>, %arg2: memref<1x8x32xf32, #tpu.memory_space<vmem>>, %arg3: memref<1x8x32xf32, #tpu.memory_space<vmem>>, %arg4: memref<3x32x128xf32, #tpu.memory_space<vmem>>, %arg5: memref<3x1x128xf32, #tpu.memory_space<vmem>>, %arg6: memref<1x8x128xf32, #tpu.memory_space<vmem>>) attributes {dimension_semantics = [#tpu.dimension_semantics<parallel>], iteration_bounds = array<i64: 2>, scalar_prefetch = 0 : i64, scratch_operands = 0 : i64, tpu.core_type = #tpu.core_type<tc>, window_params = [{transform_indices = @transform_0, window_bounds = array<i64: 1, 8, 32>}, {transform_indices = @transform_1, window_bounds = array<i64: 1, 8, 32>}, {transform_indices = @transform_2, window_bounds = array<i64: 1, 8, 32>}, {pipeline_mode = #tpu.pipeline_mode<synchronous>, transform_indices = @transform_3, window_bounds = array<i64: 3, 32, 128>}, {pipeline_mode = #tpu.pipeline_mode<synchronous>, transform_indices = @transform_4, window_bounds = array<i64: 3, 1, 128>}, {transform_indices = @transform_5, window_bounds = array<i64: 1, 8, 128>}]} {
    %c0 = arith.constant 0 : index
    %c0_0 = arith.constant 0 : index
    %c0_1 = arith.constant 0 : index
    %0 = vector.load %arg1[%c0, %c0_0, %c0_1] : memref<1x8x32xf32, #tpu.memory_space<vmem>>, vector<1x8x32xf32>
    %1 = vector.shape_cast %0 : vector<1x8x32xf32> to vector<8x32xf32>
    %c0_2 = arith.constant 0 : index
    %c0_3 = arith.constant 0 : index
    %c0_4 = arith.constant 0 : index
    %2 = vector.load %arg4[%c0_2, %c0_3, %c0_4] : memref<3x32x128xf32, #tpu.memory_space<vmem>>, vector<1x32x128xf32>
    %3 = vector.shape_cast %2 : vector<1x32x128xf32> to vector<32x128xf32>
    %cst = arith.constant dense<0.000000e+00> : vector<8x128xf32>
    %4 = tpu.matmul %1, %3, %cst {dimension_numbers = #tpu.dot_dimension_numbers<[1], [0], [0], [1], [0, 0, 1, 1], [], []>} : vector<8x32xf32>, vector<32x128xf32>, vector<8x128xf32> -> vector<8x128xf32>
    %c0_5 = arith.constant 0 : index
    %c0_6 = arith.constant 0 : index
    %c0_7 = arith.constant 0 : index
    %5 = vector.load %arg5[%c0_5, %c0_6, %c0_7] : memref<3x1x128xf32, #tpu.memory_space<vmem>>, vector<1x1x128xf32>
    %6 = vector.shape_cast %5 : vector<1x1x128xf32> to vector<1x128xf32>
    %7 = vector.broadcast %6 : vector<1x128xf32> to vector<8x128xf32>
    %8 = arith.addf %4, %7 : vector<8x128xf32>
    %9 = vector.shape_cast %8 : vector<8x128xf32> to vector<1x8x128xf32>
    %c0_8 = arith.constant 0 : index
    %c0_9 = arith.constant 0 : index
    %c0_10 = arith.constant 0 : index
    %10 = vector.load %arg2[%c0_8, %c0_9, %c0_10] : memref<1x8x32xf32, #tpu.memory_space<vmem>>, vector<1x8x32xf32>
    %11 = vector.shape_cast %10 : vector<1x8x32xf32> to vector<8x32xf32>
    %c1 = arith.constant 1 : index
    %c0_11 = arith.constant 0 : index
    %c0_12 = arith.constant 0 : index
    %12 = vector.load %arg4[%c1, %c0_11, %c0_12] : memref<3x32x128xf32, #tpu.memory_space<vmem>>, vector<1x32x128xf32>
    %13 = vector.shape_cast %12 : vector<1x32x128xf32> to vector<32x128xf32>
    %cst_13 = arith.constant dense<0.000000e+00> : vector<8x128xf32>
    %14 = tpu.matmul %11, %13, %cst_13 {dimension_numbers = #tpu.dot_dimension_numbers<[1], [0], [0], [1], [0, 0, 1, 1], [], []>} : vector<8x32xf32>, vector<32x128xf32>, vector<8x128xf32> -> vector<8x128xf32>
    %c1_14 = arith.constant 1 : index
    %c0_15 = arith.constant 0 : index
    %c0_16 = arith.constant 0 : index
    %15 = vector.load %arg5[%c1_14, %c0_15, %c0_16] : memref<3x1x128xf32, #tpu.memory_space<vmem>>, vector<1x1x128xf32>
    %16 = vector.shape_cast %15 : vector<1x1x128xf32> to vector<1x128xf32>
    %17 = vector.broadcast %16 : vector<1x128xf32> to vector<8x128xf32>
    %18 = arith.addf %14, %17 : vector<8x128xf32>
    %19 = vector.shape_cast %18 : vector<8x128xf32> to vector<1x8x128xf32>
    %c0_17 = arith.constant 0 : index
    %c0_18 = arith.constant 0 : index
    %c0_19 = arith.constant 0 : index
    %20 = vector.load %arg3[%c0_17, %c0_18, %c0_19] : memref<1x8x32xf32, #tpu.memory_space<vmem>>, vector<1x8x32xf32>
    %21 = vector.shape_cast %20 : vector<1x8x32xf32> to vector<8x32xf32>
    %c2 = arith.constant 2 : index
    %c0_20 = arith.constant 0 : index
    %c0_21 = arith.constant 0 : index
    %22 = vector.load %arg4[%c2, %c0_20, %c0_21] : memref<3x32x128xf32, #tpu.memory_space<vmem>>, vector<1x32x128xf32>
    %23 = vector.shape_cast %22 : vector<1x32x128xf32> to vector<32x128xf32>
    %cst_22 = arith.constant dense<0.000000e+00> : vector<8x128xf32>
    %24 = tpu.matmul %21, %23, %cst_22 {dimension_numbers = #tpu.dot_dimension_numbers<[1], [0], [0], [1], [0, 0, 1, 1], [], []>} : vector<8x32xf32>, vector<32x128xf32>, vector<8x128xf32> -> vector<8x128xf32>
    %c2_23 = arith.constant 2 : index
    %c0_24 = arith.constant 0 : index
    %c0_25 = arith.constant 0 : index
    %25 = vector.load %arg5[%c2_23, %c0_24, %c0_25] : memref<3x1x128xf32, #tpu.memory_space<vmem>>, vector<1x1x128xf32>
    %26 = vector.shape_cast %25 : vector<1x1x128xf32> to vector<1x128xf32>
    %27 = vector.broadcast %26 : vector<1x128xf32> to vector<8x128xf32>
    %28 = arith.addf %24, %27 : vector<8x128xf32>
    %29 = vector.shape_cast %28 : vector<8x128xf32> to vector<1x8x128xf32>
    "tpu.trace_start"() <{level = 10 : i32, message = "bqd,bkd->bqk"}> : () -> ()
    %cst_26 = arith.constant dense<0.000000e+00> : vector<1x8x8xf32>
    %30 = tpu.matmul %9, %19, %cst_26 {dimension_numbers = #tpu.dot_dimension_numbers<[2], [2], [1], [1], [0, 0, 0, 1, 1, 1], [0], [0]>} : vector<1x8x128xf32>, vector<1x8x128xf32>, vector<1x8x8xf32> -> vector<1x8x8xf32>
    "tpu.trace_stop"() : () -> ()
    %cst_27 = arith.constant dense<0xFF800000> : vector<1x8xf32>
    %31 = vector.multi_reduction <maximumf>, %30, %cst_27 [2] : vector<1x8x8xf32> to vector<1x8xf32>
    %32 = vector.shape_cast %31 : vector<1x8xf32> to vector<1x8x1xf32>
    %33 = vector.broadcast %32 : vector<1x8x1xf32> to vector<1x8x8xf32>
    %34 = arith.subf %30, %33 : vector<1x8x8xf32>
    %35 = math.exp %34 : vector<1x8x8xf32>
    %cst_28 = arith.constant dense<0.000000e+00> : vector<1x8xf32>
    %36 = vector.multi_reduction <add>, %35, %cst_28 [2] : vector<1x8x8xf32> to vector<1x8xf32>
    %37 = vector.shape_cast %36 : vector<1x8xf32> to vector<1x8x1xf32>
    %38 = tpu.reciprocal %37 {approx = true} : vector<1x8x1xf32> -> vector<1x8x1xf32>
    %39 = arith.mulf %37, %38 : vector<1x8x1xf32>
    %cst_29 = arith.constant 2.000000e+00 : f32
    %40 = vector.broadcast %cst_29 : f32 to vector<1x8x1xf32>
    %41 = arith.subf %40, %39 : vector<1x8x1xf32>
    %42 = arith.mulf %38, %41 : vector<1x8x1xf32>
    %43 = vector.broadcast %42 : vector<1x8x1xf32> to vector<1x8x8xf32>
    %44 = arith.mulf %35, %43 : vector<1x8x8xf32>
    "tpu.trace_start"() <{level = 10 : i32, message = "bqk,bkd->bqd"}> : () -> ()
    %cst_30 = arith.constant dense<0.000000e+00> : vector<1x8x128xf32>
    %45 = tpu.matmul %44, %29, %cst_30 {dimension_numbers = #tpu.dot_dimension_numbers<[2], [1], [1], [2], [0, 0, 0, 1, 1, 2], [0], [0]>} : vector<1x8x8xf32>, vector<1x8x128xf32>, vector<1x8x128xf32> -> vector<1x8x128xf32>
    "tpu.trace_stop"() : () -> ()
    %c0_31 = arith.constant 0 : index
    %c0_32 = arith.constant 0 : index
    %c0_33 = arith.constant 0 : index
    %46 = vector.load %arg6[%c0_31, %c0_32, %c0_33] : memref<1x8x128xf32, #tpu.memory_space<vmem>>, vector<1x8x128xf32>
    tpu.vector_store %arg6[%c0_31, %c0_32, %c0_33], %45 {strides = array<i32>} : memref<1x8x128xf32, #tpu.memory_space<vmem>>, vector<1x8x128xf32>,
    return
  }
  func.func @transform_0(%arg0: i32) -> (i32, i32, i32) {
    %c0_i32 = arith.constant 0 : i32
    %c0_i32_0 = arith.constant 0 : i32
    %c0_i32_1 = arith.constant 0 : i32
    return %arg0, %c0_i32, %c0_i32_0 : i32, i32, i32
  }
  func.func @transform_1(%arg0: i32) -> (i32, i32, i32) {
    %c0_i32 = arith.constant 0 : i32
    %c0_i32_0 = arith.constant 0 : i32
    %c0_i32_1 = arith.constant 0 : i32
    return %arg0, %c0_i32, %c0_i32_0 : i32, i32, i32
  }
  func.func @transform_2(%arg0: i32) -> (i32, i32, i32) {
    %c0_i32 = arith.constant 0 : i32
    %c0_i32_0 = arith.constant 0 : i32
    %c0_i32_1 = arith.constant 0 : i32
    return %arg0, %c0_i32, %c0_i32_0 : i32, i32, i32
  }
  func.func @transform_3(%arg0: i32) -> (i32, i32, i32) {
    %c0_i32 = arith.constant 0 : i32
    %c0_i32_0 = arith.constant 0 : i32
    %c0_i32_1 = arith.constant 0 : i32
    %c0_i32_2 = arith.constant 0 : i32
    return %c0_i32, %c0_i32_0, %c0_i32_1 : i32, i32, i32
  }
  func.func @transform_4(%arg0: i32) -> (i32, i32, i32) {
    %c0_i32 = arith.constant 0 : i32
    %c0_i32_0 = arith.constant 0 : i32
    %c0_i32_1 = arith.constant 0 : i32
    %c0_i32_2 = arith.constant 0 : i32
    return %c0_i32, %c0_i32_0, %c0_i32_1 : i32, i32, i32
  }
  func.func @transform_5(%arg0: i32) -> (i32, i32, i32) {
    %c0_i32 = arith.constant 0 : i32
    %c0_i32_0 = arith.constant 0 : i32
    %c0_i32_1 = arith.constant 0 : i32
    return %arg0, %c0_i32, %c0_i32_0 : i32, i32, i32
  }
}

</mosaic_0001>

<bundles_post_ra>
// kernel: tpu_custom_call.1
= control target key start
LH: loop header
LB: loop body
LE: loop exit
PB: predicated region body
PF: predicated region fallthrough
CT: control target
= control target key end

     0   :  { %s1553_s0 = inlined_call_operand.hbm [shape: f32[2,8,32], index: 0, kind: input, shape index: {}]   ;;  %s1554_s1 = inlined_call_operand.hbm [shape: f32[2,8,32], index: 1, kind: input, shape index: {}]   ;;  %s1555_s2 = inlined_call_operand.hbm [shape: f32[2,8,32], index: 2, kind: input, shape index: {}]   ;;  %s1556_s3 = inlined_call_operand.hbm [shape: f32[3,32,128], index: 3, kind: input, shape index: {}]   ;;  %s1557_s4 = inlined_call_operand.vmem [shape: f32[3,1,128], index: 4, kind: input, shape index: {}]   ;;  %s1558_s5 = inlined_call_operand.hbm [shape: f32[2,8,128], index: 5, kind: output, shape index: {}]  }
   0x1   :  { %1571 = sst [smem:[#allocation20_spill]] %s1554_s1 }
   0x2   :  { %1572 = sst [smem:[#allocation21_spill]] %s1558_s5 }
   0x3   :  { %10 = vsyncpa [#allocation3], 0 }
   0x4   :  { %12 = vsyncpa [#allocation3 + $0x1], 0 }
   0x5   :  { %13 = vsyncpa [#allocation6], 0 }
   0x6   :  { %15 = vsyncpa [#allocation6 + $0x1], 0 }
   0x7   :  { %16 = vsyncpa [#allocation9], 0 }
   0x8   :  { %17 = vsyncpa [#allocation4], 0 }
   0x9   :  { %19 = vsyncpa [#allocation4 + $0x1], 0  ;;  %s1271_s18 = smov 0   ;;  %s1273_s19 = smov 0  }
   0xa   :  { %s1275_s20 = smov 0   ;;  %s1277_s21 = smov 0  }
   0xb LB: > { %1573 = sst [smem:[#allocation15_spill]] %s1218_s18  ;;  %s1292_s22 = sadd.s32 1, %s1230_s21   ;;  %s1230_s21 = sphi %s1277_s21, %s1599_s21   ;;  %s1226_s20 = sphi %s1275_s20, %s1603_s20   ;;  %s1222_s19 = sphi %s1273_s19, %s1602_s19   ;;  %s1218_s18 = sphi %s1271_s18, %s1601_s18  }
   0xc   : > { %1574 = sst [smem:[#allocation16_spill]] %s1230_s21  ;;  %s32_s23 = sadd.s32 1, %s1226_s20 }
   0xd   : > { %1575 = sst [smem:[#allocation17_spill]] %s1292_s22  ;;  %s29_s24 = ssub.s32 %s1230_s21, %s1292_s22 }
   0xe   : > { %p1559_p0 = scmp.ne.s32.totalorder %s1226_s20, %s1222_s19  ;;  %p30_p1 = scmp.eq.s32.totalorder %s29_s24, 0 }
   0xf   : > { %p40_p2 = scmp.eq.s32.totalorder %s1230_s21, 0  ;;  %p1004_p4 = scmp.lt.s32.totalorder %s1230_s21, 2 }
  0x10   : > { %s1303_s25 = scalar_select %p30_p1, %s1226_s20, %s32_s23  }
  0x11   : > { %p41_p5 = por %p40_p2, %p1559_p0  ;;  %s1560_s26 = sand.u32 1, %s1226_s20  }
  0x12   : > { %1576 = sst [smem:[#allocation18_spill]] %s1303_s25  ;;  %s1311_s27 = sshll.u32 %s1560_s26, 3 }
  0x13   : > { %s1314_s28 = sshll.u32 %s1230_s21, 7  ;;  %p1316_p6 = pnand %p1004_p4, %p41_p5 }
  0x14   : > { %s223_s30 = sand.u32 1, %s1230_s21   ;;  %s1578_s1 = sld [smem:[#allocation20_spill]] }
  0x15   : > { %s227_s9 = scalar_lea.vmem [#allocation5], %s1311_s27  ;;  %s1328_s11 = scalar_lea.sflag [#allocation6], %s223_s30 }
  0x16   : > { %s234_s10 = sshll.u32 %s227_s9, 4  ;;  %p1334_p8 = pneg %p1316_p6  ;;  %s235_s10 = int_to_ptr.vmem [resolvable:$true] %s234_s10 }
  0x1a   : > { %s1325_s8 = scalar_lea.hbm %s1578_s1, %s1314_s28  ;;  %s1053_s16 = scalar_lea.hbm %s1578_s1, 256 }
  0x1b   : > { %s1048_s12 = scalar_lea.hbm %s1325_s8, 128  ;;  %p1054_p11 = scmp.lt.s32.totalorder %s1325_s8, %s1578_s1 }
  0x1c   : > { %p1049_p7 = scmp.ne.s32.totalorder %s1325_s8, %s1048_s12  ;;  %p1055_p12 = scmp.lt.s32.totalorder %s1053_s16, %s1048_s12 }
  0x1e   : > { %p1051_p9 = pnand %p1334_p8, %p1049_p7  ;;  %p1056_p13 = por %p1055_p12, %p1054_p11 }
  0x20   : > { %p1052_p10 = pneg %p1051_p9 }
  0x22   : > { %p1057_p1 = pnand %p1056_p13, %p1052_p10 }
  0x24   : > { %1060 = shalt.err (!%p1057_p1)
}
  0x25   : > { %s1061_s24 = scalar_lea.vmem %s235_s10, 128  ;;  %s1232_s30 = smov [#allocation5]  }
  0x26   : > { %p1062_p2 = scmp.ne.s32.totalorder %s235_s10, %s1061_s24  ;;  %s1066_s6 = sshll.u32 %s1232_s30, 4  ;;  %s1067_s6 = int_to_ptr.vmem [resolvable:$false] %s1066_s6 }
  0x27   : > { %s1068_s7 = scalar_lea.vmem %s1067_s6, 256  ;;  %p1069_p7 = scmp.lt.s32.totalorder %s235_s10, %s1067_s6 }
  0x28   : > { %p1064_p4 = pnand %p1062_p2, %p1334_p8  ;;  %p1070_p9 = scmp.lt.s32.totalorder %s1068_s7, %s1061_s24 }
  0x2a   : > { %p1065_p5 = pneg %p1064_p4  ;;  %p1071_p3 = por %p1070_p9, %p1069_p7 }
  0x2c   : > { %p1072_p0 = pnand %p1071_p3, %p1065_p5 }
  0x2e   : > { %1075 = shalt.err (!%p1072_p0)
}
  0x2f   : > { %995 = dma.hbm_to_vmem [thread:$0]  (!%p1316_p6), %s1325_s8, 128, %s235_s10, %s1328_s11  }
  0x30   : > { %s1354_s9 = sadd.s32 4294967295, %s1230_s21   ;;  %s882_s12 = sadd.s32 4294967294, %s1230_s21  }
  0x31   : > { %p45_p0 = scmp.ne.s32.totalorder %s1222_s19, %s1218_s18  ;;  %p1561_p3 = scmp.eq.s32.totalorder %s1354_s9, 0 }
  0x32   : > { %p163_p10 = scmp.eq.s32.totalorder %s1354_s9, 1  ;;  %p169_p11 = scmp.eq.s32.totalorder %s882_s12, 1 }
  0x33   : > { %p1363_p12 = por %p1561_p3, %p45_p0  ;;  %p883_p13 = scmp.ge.s32.totalorder %s1230_s21, 1 }
  0x34   : > { %p1581_p1 = scmp.ne.s32.totalorder %s1226_s20, %s1222_s19  ;;  %p1375_p4 = por %p169_p11, %p45_p0 }
  0x35   : > { %s1580_s14 = scalar_select %p1363_p12, 1, 0 }
  0x36   : > { %p1371_p2 = por %p163_p10, %p1581_p1  ;;  %p176_p5 = scmp.lt.s32.totalorder %s1230_s21, 3 }
  0x37   : > { %s1583_s10 = scalar_select %p1375_p4, 1, 0 }
  0x38   : > { %s1582_s8 = scalar_select %p1371_p2, 1, 0 }
  0x39   : > { %1584 = sst [smem:[#allocation19_spill]] %s1583_s10  ;;  %p1380_p7 = pnand %p883_p13, %p176_p5 }
  0x3a   : > { %s1233_s16 = smov [#allocation8]   ;;  %s1390_s30 = scalar_lea.hbm %s1553_s0, %s1314_s28 }
  0x3b   : > { %s1585_s15 = scalar_select %p1380_p7, 1, 0 }
  0x3c   : > { %s188_s17 = sshll.u32 %s1233_s16, 4  ;;  %p985_p9 = pneg %p1380_p7  ;;  %s189_s17 = int_to_ptr.vmem [resolvable:$true] %s188_s17 }
  0x3d   : > { %s209_s7 = scalar_lea.vmem [#allocation2], %s1311_s27  ;;  %s1405_s1 = scalar_lea.hbm %s1555_s2, %s1314_s28 }
  0x3e   : > { %p1394_p0 = pnand %p985_p9, %p1561_p3  ;;  %s216_s12 = sshll.u32 %s209_s7, 4  ;;  %s1399_s12 = int_to_ptr.vmem [resolvable:$true] %s216_s12 }
  0x3f   : > { %s1087_s23 = scalar_lea.vmem %s189_s17, 1536  ;;  %p1095_p5 = scmp.lt.s32.totalorder %s189_s17, %s189_s17 }
  0x40   : > { %p1078_p10 = pneg %p1394_p0  ;;  %p1088_p11 = scmp.ne.s32.totalorder %s189_s17, %s1087_s23 }
  0x41   : > { %p1096_p9 = scmp.lt.s32.totalorder %s1087_s23, %s1087_s23 }
  0x42   : > { %p1090_p13 = pnand %p1088_p11, %p1078_p10 }
  0x43   : > { %p1097_p3 = por %p1096_p9, %p1095_p5 }
  0x44   : > { %p1091_p1 = pneg %p1090_p13 }
  0x46   : > { %p1098_p4 = pnand %p1097_p3, %p1091_p1 }
  0x48   : > { %1101 = shalt.err (!%p1098_p4)
}
  0x49   : > { %s1234_s24 = smov 128   ;;  %s1235_s26 = smov 8  }
  0x4a   : > { %988 = dma.hbm_to_vmem [thread:$0]  (!%p1394_p0), %s1556_s3, 1536, %s189_s17, [#allocation9], %s1234_s24, %s1234_s24, %s1235_s26  }
  0x4b   : > { %s1587_s16 = sand.u32 1, %s1226_s20   ;;  %s1102_s22 = scalar_lea.hbm %s1390_s30, 128 }
  0x4c   : > { %s206_s25 = scalar_lea.sflag [#allocation3], %s1587_s16  ;;  %p1103_p10 = scmp.ne.s32.totalorder %s1390_s30, %s1102_s22 }
  0x4d   : > { %s1107_s10 = scalar_lea.hbm %s1553_s0, 256  ;;  %p1108_p11 = scmp.lt.s32.totalorder %s1390_s30, %s1553_s0 }
  0x4e   : > { %p1105_p3 = pnand %p1103_p10, %p1334_p8  ;;  %p1109_p13 = scmp.lt.s32.totalorder %s1107_s10, %s1102_s22 }
  0x50   : > { %p1106_p4 = pneg %p1105_p3  ;;  %p1110_p1 = por %p1109_p13, %p1108_p11 }
  0x52   : > { %p1111_p5 = pnand %p1110_p1, %p1106_p4 }
  0x54   : > { %1114 = shalt.err (!%p1111_p5)
}
  0x55   : > { %s1115_s17 = scalar_lea.vmem %s1399_s12, 128  ;;  %s1236_s6 = smov [#allocation2]  }
  0x56   : > { %p1116_p0 = scmp.ne.s32.totalorder %s1399_s12, %s1115_s17  ;;  %s1120_s21 = sshll.u32 %s1236_s6, 4  ;;  %s1121_s21 = int_to_ptr.vmem [resolvable:$false] %s1120_s21 }
  0x57   : > { %s1122_s24 = scalar_lea.vmem %s1121_s21, 256  ;;  %p1123_p3 = scmp.lt.s32.totalorder %s1399_s12, %s1121_s21 }
  0x58   : > { %p1118_p9 = pnand %p1116_p0, %p1334_p8  ;;  %p1124_p2 = scmp.lt.s32.totalorder %s1122_s24, %s1115_s17 }
  0x5a   : > { %p1119_p10 = pneg %p1118_p9  ;;  %p1125_p12 = por %p1124_p2, %p1123_p3 }
  0x5c   : > { %p1126_p7 = pnand %p1125_p12, %p1119_p10 }
  0x5e   : > { %1129 = shalt.err (!%p1126_p7)
}
  0x5f   : > { %992 = dma.hbm_to_vmem [thread:$0]  (!%p1316_p6), %s1390_s30, 128, %s1399_s12, %s206_s25  }
  0x60   : > { %s245_s5 = scalar_lea.vmem [#allocation7], %s1311_s27  ;;  %s1130_s22 = scalar_lea.hbm %s1405_s1, 128 }
  0x61   : > { %s252_s18 = sshll.u32 %s245_s5, 4  ;;  %p1131_p4 = scmp.ne.s32.totalorder %s1405_s1, %s1130_s22  ;;  %s253_s18 = int_to_ptr.vmem [resolvable:$true] %s252_s18 }
  0x62   : > { %s1135_s28 = scalar_lea.hbm %s1555_s2, 256  ;;  %p1136_p12 = scmp.lt.s32.totalorder %s1405_s1, %s1555_s2 }
  0x63   : > { %p1133_p11 = pnand %p1131_p4, %p1334_p8  ;;  %p1137_p7 = scmp.lt.s32.totalorder %s1135_s28, %s1130_s22 }
  0x65   : > { %p1134_p2 = pneg %p1133_p11  ;;  %p1138_p13 = por %p1137_p7, %p1136_p12 }
  0x67   : > { %p1139_p1 = pnand %p1138_p13, %p1134_p2 }
  0x69   : > { %1142 = shalt.err (!%p1139_p1)
}
  0x6a   : > { %s1143_s25 = scalar_lea.vmem %s253_s18, 128  ;;  %s1237_s27 = smov [#allocation7]  }
  0x6b   : > { %p1144_p5 = scmp.ne.s32.totalorder %s253_s18, %s1143_s25  ;;  %s1148_s30 = sshll.u32 %s1237_s27, 4  ;;  %s1149_s30 = int_to_ptr.vmem [resolvable:$false] %s1148_s30 }
  0x6c   : > { %s1150_s12 = scalar_lea.vmem %s1149_s30, 256  ;;  %p1151_p10 = scmp.lt.s32.totalorder %s253_s18, %s1149_s30 }
  0x6d   : > { %p1146_p0 = pnand %p1144_p5, %p1334_p8  ;;  %p1152_p3 = scmp.lt.s32.totalorder %s1150_s12, %s1143_s25 }
  0x6f   : > { %p1147_p9 = pneg %p1146_p0  ;;  %p1153_p4 = por %p1152_p3, %p1151_p10 }
  0x71   : > { %p1154_p11 = pnand %p1153_p4, %p1147_p9 }
  0x73   : > { %1157 = shalt.err (!%p1154_p11)
}
  0x74   : > { %998 = dma.hbm_to_vmem [thread:$0]  (!%p1316_p6), %s1405_s1, 128, %s253_s18, %s1328_s11  }
  0x75   : > { %p1588_p2 = scmp.ne.s32.totalorder %s1585_s15, 0 }
  0x76   : > { %s1457_s13 = sand.u32 (!%p1588_p2), 1, %s1222_s19   ;;  %p1589_p8 = scmp.ne.s32.totalorder (!%p1588_p2), %s1580_s14, 0 }
  0x77   : > { %261 = sbr.rel (%p1588_p2) target bundleno = 1057 (0x421), region = 40  ;;  %s1460_s23 = sshll.u32 (!%p1588_p2), %s1457_s13, 3 }
  0x78   : > { %s264_s17 = scalar_lea.sflag (!%p1588_p2), [#allocation3], %s1457_s13  ;;  %s267_s6 = scalar_lea.vmem (!%p1588_p2), [#allocation2], %s1460_s23 }
  0x7c   : > { %1201 = dma.done.wait (%p1589_p8), %s264_s17, 128  }
  0x7d   : > { %1203 = vsyncadd (%p1589_p8), %s264_s17, 4294967168  ;;  %s272_s1 = sand.u32 1, %s1354_s9   ;;  %s276_s11 = scalar_lea.vmem [#allocation5], %s1460_s23 }
  0x7e   : > { %s273_s29 = scalar_lea.sflag [#allocation6], %s272_s1 }
  0x7f   : > { %1205 = dma.done.wait (%p1589_p8), %s273_s29, 256  }
  0x80   : > { %1207 = vsyncadd (%p1589_p8), %s273_s29, 4294967040  ;;  %s285_s15 = scalar_lea.vmem [#allocation7], %s1460_s23  ;;  %p1590_p6 = scmp.eq.s32.totalorder %s1354_s9, 0 }
  0x82   : > { %1209 = dma.done.wait (%p1590_p6), [#allocation9], 1536   ;;  %p1591_p12 = pmov %p1590_p6 }
  0x83   : > { %v1238_v0 = vmov 0.0   ;;  %vm1239_vm0 = vmmov 0   ;;  %v417_v1 = vld [vmem:[#allocation8 + $0x38] sm:$0xff]  ;;  %v416_v3 = vld [vmem:[#allocation8 + $0x30] sm:$0xff]  ;;  %v415_v5 = vld [vmem:[#allocation8 + $0x28] sm:$0xff]  ;;  %vm338_vm1 = vcmask 261120  }
  0x84   : > { %1211 = vsyncadd (%p1591_p12), [#allocation9], 4294965760  ;;  %941 = vmatprep.subr.mxu1 %v1238_v0  ;;  %930 = vmatprep.subr.mxu0 %v1238_v0  ;;  %v330_v2 = vld [vmem:[#allocation8 + $0x18] sm:$0xff]  ;;  %v329_v4 = vld [vmem:[#allocation8 + $0x10] sm:$0xff]  ;;  %vm656_vm2 = vcmask 64512   ;;  %s325_s10 = scalar_lea.vmem [#allocation10], %s1460_s23 }
  0x85   : > { %949 = vmatprep.mubr.msk.f32.mxu1 %vm1239_vm0, %v1238_v0  ;;  %938 = vmatprep.mubr.msk.f32.mxu0 %vm1239_vm0, %v1238_v0  ;;  %v328_v6 = vld [vmem:[#allocation8 + $0x8] sm:$0xff]  ;;  %v414_v7 = vld [vmem:[#allocation8 + $0x20] sm:$0xff]  ;;  %v326_v10 = vld [vmem:[%s267_s6] sm:$0xff]  ;;  %s759_s26 = sshll.u32 %s325_s10, 4  ;;  %s908_s28 = sshll.u32 %s1354_s9, 7  ;;  %s1507_s26 = int_to_ptr.vmem [resolvable:$true] %s759_s26 }
  0x86   : > { %942 = vmatpush3.msra.mxu1 %v417_v1  ;;  %931 = vmatpush3.msra.mxu0 %v330_v2  ;;  %v327_v8 = vld [vmem:[#allocation8] sm:$0xff]  ;;  %v901_v11 = vld [vmem:[%s1557_s4 + $0x1] ss:$0 sm:$0xff]  ;;  %v898_v12 = vld [vmem:[%s1557_s4] ss:$0 sm:$0xff]  ;;  %s1592_s25 = sld [smem:[#allocation21_spill]] }
  0x87   : > { %943 = vmatprep.subr.mxu1 %v1238_v0  ;;  %932 = vmatprep.subr.mxu0 %v1238_v0  ;;  %v412_v9 = vld [vmem:[%s276_s11] sm:$0xff]  ;;  %v504_v19 = vld [vmem:[#allocation8 + $0x58] sm:$0xff]  ;;  %v503_v20 = vld [vmem:[#allocation8 + $0x50] sm:$0xff]  ;;  %s746_s30 = scalar_lea.sflag [#allocation4], %s1457_s13  ;;  %s1158_s12 = scalar_lea.vmem %s1507_s26, 128 }
  0x88   : > { %944 = vmatpush3.msra.mxu1 %v416_v3  ;;  %933 = vmatpush3.msra.mxu0 %v329_v4  ;;  %v502_v21 = vld [vmem:[#allocation8 + $0x48] sm:$0xff]  ;;  %v501_v22 = vld [vmem:[#allocation8 + $0x40] sm:$0xff]  ;;  %v499_v23 = vld [vmem:[%s285_s15] sm:$0xff]  ;;  %p1159_p7 = scmp.ne.s32.totalorder %s1507_s26, %s1158_s12  ;;  %p1593_p13 = scmp.ne.s32.totalorder %s1582_s8, 0 }
  0x89   : > { %945 = vmatprep.subr.mxu1 %v1238_v0  ;;  %934 = vmatprep.subr.mxu0 %v1238_v0  ;;  %v904_v33 = vld [vmem:[%s1557_s4 + $0x2] ss:$0 sm:$0xff]  ;;  %s1240_s9 = smov [#allocation10]  }
  0x8a   : > { %946 = vmatpush3.msra.mxu1 %v415_v5  ;;  %935 = vmatpush3.msra.mxu0 %v328_v6  ;;  %p1160_p1 = pnand %p1159_p7, %p1593_p13  ;;  %s1162_s23 = sshll.u32 %s1240_s9, 4  ;;  %s1163_s23 = int_to_ptr.vmem [resolvable:$false] %s1162_s23 }
  0x8b   : > { %947 = vmatprep.subr.mxu1 %v1238_v0  ;;  %936 = vmatprep.subr.mxu0 %v1238_v0  ;;  %s1164_s17 = scalar_lea.vmem %s1163_s23, 256  ;;  %p1165_p0 = scmp.lt.s32.totalorder %s1507_s26, %s1163_s23 }
  0x8c   : > { %948 = vmatpush3.msra.mxu1 %v414_v7  ;;  %937 = vmatpush3.msra.mxu0 %v327_v8  ;;  %s1512_s27 = scalar_lea.hbm %s1592_s25, %s908_s28  ;;  %p1161_p5 = pneg %p1160_p1 }
  0x8d   : > { %950 = vmatmul.mubr.msk.f32.vlgmr.msra.gmra.mxu1 %vm338_vm1, %v412_v9  ;;  %939 = vmatmul.mubr.msk.f32.vlgmr.msra.gmra.mxu0 %vm338_vm1, %v326_v10  ;;  %p1166_p9 = scmp.lt.s32.totalorder %s1164_s17, %s1158_s12 }
  0x8e   : > { %963 = vmatprep.subr.mxu1 %v1238_v0  ;;  %965 = vmatprep.mubr.msk.f32.mxu1 %vm1239_vm0, %v1238_v0 }
  0x8f   : > { %952 = vmatprep.subr.mxu0 %v1238_v0  ;;  %960 = vmatprep.mubr.msk.f32.mxu0 %vm1239_vm0, %v1238_v0  ;;  %p1167_p10 = por %p1166_p9, %p1165_p0 }
  0x90   : > { %953 = vmatpush3.msra.mxu0 %v504_v19 }
  0x91   : > { %954 = vmatprep.subr.mxu0 %v1238_v0  ;;  %p1168_p3 = pnand %p1167_p10, %p1161_p5 }
  0x92   : > { %955 = vmatpush3.msra.mxu0 %v503_v20 }
  0x93   : > { %956 = vmatprep.subr.mxu0 %v1238_v0 }
  0x94   : > { %957 = vmatpush3.msra.mxu0 %v502_v21 }
  0x95   : > { %958 = vmatprep.subr.mxu0 %v1238_v0 }
  0x96   : > { %959 = vmatpush3.msra.mxu0 %v501_v22 }
  0x97   : > { %961 = vmatmul.mubr.msk.f32.vlgmr.msra.gmra.mxu0 %vm338_vm1, %v499_v23 }
 0x14d   : > { %v495_v13 = vpop.f32.mrf.mxu1  ;;  %v408_v14 = vpop.f32.mrf.mxu0 }
 0x14e   : > { %v496_v15 = vadd.f32 %v901_v11, %v495_v13  ;;  %v409_v16 = vadd.f32 %v898_v12, %v408_v14 }
 0x14f   : > { %v951_v17 = vpop.f32.mrf.mxu1  ;;  %v940_v18 = vpop.f32.mrf.mxu0 }
 0x150   : > { %964 = vmatpush3.xpose.msra.mxu1 %v496_v15 }
 0x151   : > { %968 = vmatprep.subr.mxu1 %v1238_v0 }
 0x153   : > { %966 = vmatmul.mubr.f32.vlgmr.msra.gmra.mxu1 %v409_v16 }
 0x154   : > { %970 = vmatprep.mubr.msk.f32.mxu1 %vm1239_vm0, %v1238_v0 }
 0x157   : > { %v582_v32 = vpop.f32.mrf.mxu0 }
 0x158   : > { %v583_v35 = vadd.f32 %v904_v33, %v582_v32 }
 0x159   : > { %v962_v34 = vpop.f32.mrf.mxu0 }
 0x15a   : > { %969 = vmatpush3.msra.mxu1 %v583_v35 }
 0x213   : > { %v652_v24 = vpop.f32.mrf.mxu1 }
 0x214   : > { %v657_v25 = vsel %vm656_vm2, %v652_v24, -inf }
 0x215   : > { %658 = vmax.xlane.f32.xlu0 %v657_v25  ;;  %v967_v26 = vpop.f32.mrf.mxu1 }
 0x29e   : > { %v659_v27 = vpop.xlane.xlu0 %658 }
 0x29f   : > { %v660_v28 = vsub.f32 %v652_v24, %v659_v27 }
 0x2a1   : > { %v661_v29 = vmul.f32 1.442695, %v660_v28 }
 0x2a3   : > { %1044 = vpow2.f32 %v661_v29 }
 0x2b0   : > { %v1045_v30 = vpop.eup %1044 }
 0x2b1   : > { %v663_v31 = vsel %vm656_vm2, %v1045_v30, 0.0 }
 0x2b2   : > { %664 = vadd.xlane.f32.xlu0 %v663_v31 }
 0x33b   : > { %v665_v36 = vpop.xlane.xlu0 %664 }
 0x33c   : > { %1046 = vrcp.f32 %v665_v36 }
 0x349   : > { %v1047_v37 = vpop.eup %1046 }
 0x34a   : > { %v667_v38 = vmul.f32 %v1047_v37, %v665_v36 }
 0x34c   : > { %v668_v39 = vsub.f32 2.0, %v667_v38 }
 0x34e   : > { %v669_v40 = vmul.f32 %v1047_v37, %v668_v39 }
 0x350   : > { %v670_v41 = vmul.f32 %v1045_v30, %v669_v40 }
 0x352   : > { %971 = vmatmul.mubr.msk.f32.vlgmr.msra.gmra.mxu1 %vm656_vm2, %v670_v41 }
 0x412   : > { %v740_v42 = vpop.f32.mrf.mxu1 }
 0x413   : > { %744 = vst [vmem:[%s325_s10] sm:$0xff] %v740_v42 }
 0x414   : > { %v972_v43 = vpop.f32.mrf.mxu1 }
 0x415   : > { %1171 = shalt.err (!%p1168_p3)
}
 0x416   : > { %s1172_s6 = scalar_lea.hbm %s1512_s27, 128  ;;  %s1176_s29 = scalar_lea.hbm %s1592_s25, 256 }
 0x417   : > { %p1173_p4 = scmp.ne.s32.totalorder %s1512_s27, %s1172_s6  ;;  %p1177_p8 = scmp.lt.s32.totalorder %s1512_s27, %s1592_s25 }
 0x418   : > { %p1178_p6 = scmp.lt.s32.totalorder %s1176_s29, %s1172_s6 }
 0x419   : > { %p1174_p11 = pnand %p1173_p4, %p1593_p13 }
 0x41a   : > { %p1179_p12 = por %p1178_p6, %p1177_p8 }
 0x41b   : > { %p1175_p2 = pneg %p1174_p11 }
 0x41d   : > { %p1180_p7 = pnand %p1179_p12, %p1175_p2 }
 0x41f   : > { %1183 = shalt.err (!%p1180_p7)
}
 0x420   : > { %983 = dma.vmem_to_hbm [thread:$0]  (%p1593_p13), %s1507_s26, 128, %s1512_s27, %s746_s30  }
 0x421 PF: > { %s1594_s14 = sld [smem:[#allocation15_spill]] }
 0x422   : > { %s1595_s21 = sld [smem:[#allocation19_spill]] }
 0x423   : > { %s1596_s24 = sld [smem:[#allocation16_spill]] }
 0x427   : > { %s771_s5 = sand.u32 1, %s1594_s14  }
 0x428   : > { %p1597_p1 = scmp.ne.s32.totalorder %s1595_s21, 0  ;;  %s772_s18 = scalar_lea.sflag [#allocation4], %s771_s5 }
 0x429   : > { %p1598_p5 = scmp.ge.s32.totalorder %s1596_s24, 2 }
 0x42b   : > { %p1000_p0 = pnand %p1598_p5, %p1597_p1 }
 0x42d   : > { %p1001_p9 = pneg %p1000_p0 }
 0x42f   : > { %1213 = dma.done.wait (%p1001_p9), %s772_s18, 128  }
 0x430   : > { %1215 = vsyncadd (%p1001_p9), %s772_s18, 4294967168  ;;  %s1599_s21 = sld [smem:[#allocation17_spill]]  ;;  %s1601_s18 = smov %s1222_s19 }
 0x431   : > { %s1600_s22 = sld [smem:[#allocation18_spill]]  ;;  %s1602_s19 = smov %s1226_s20 }
 0x436   : > { %p22_p10 = scmp.ge.s32.totalorder %s1599_s21, 4  }
 0x437   : > { %s1603_s20 = smov %s1600_s22 }
 0x438   :  { %24 = sbr.rel (!%p22_p10) target bundleno = 11 (0xb), region = 117 }
 0x43d   :  { %777 = vsyncpa [#allocation3], 1 }
 0x43e   :  { %779 = vsyncpa [#allocation3 + $0x1], 1 }
 0x43f   :  { %780 = vsyncpa [#allocation6], 1 }
 0x440   :  { %782 = vsyncpa [#allocation6 + $0x1], 1 }
 0x441   :  { %783 = vsyncpa [#allocation9], 1 }
 0x442   :  { %784 = vsyncpa [#allocation4], 1 }
 0x443   :  { %786 = vsyncpa [#allocation4 + $0x1], 1 }

</bundles_post_ra>
